<compile_context>
chip_gen: v6e
topology: v6e:2x2x1
jax: 0.10.0
libtpu: 0.0.40
codegen_flags: <defaults>
</compile_context>

<pallas_src>
import functools

import jax
import jax.numpy as jnp
from jax.experimental import pallas as pl
from jax.experimental.pallas import tpu as pltpu

_BN_EPS = 1e-5
_VMEM_LIMIT = 32 * 1024 * 1024


def _round_up(x, m):
    return ((x + m - 1) // m) * m


@functools.lru_cache(maxsize=1)
def _vmem_capacity_bytes():
    try:
        return int(getattr(pltpu.get_tpu_info(), "vmem_capacity_bytes", 0))
    except Exception:
        return 0


def _pick_tm(m):
    tm = min(256, _round_up(m, 8))
    # v5e/v6e have 128 MiB of physical VMEM -> bigger M tiles halve grid steps; v7x (64 MiB)
    # keeps the conservative 256 so the double-buffered blocks stay within budget.
    if m >= 512 and _vmem_capacity_bytes() >= 96 * 1024 * 1024:
        tm = 512
    return tm


# ------------- Pallas tiled matmul (bf16 operands, f32 acc, fused bias/ReLU/BN-stats) -------

def _matmul_kernel(*refs, relu, has_bias, compute_stats):
    a_ref, b_ref = refs[0], refs[1]
    pos = 2
    bias_ref = None
    if has_bias:
        bias_ref = refs[pos]
        pos += 1
    o_ref = refs[pos]
    pos += 1
    st_ref = None
    if compute_stats:
        st_ref = refs[pos]
        pos += 1
    acc_ref = refs[pos]

    @pl.when(pl.program_id(2) == 0)
    def _():
        acc_ref[...] = jnp.zeros_like(acc_ref)

    acc_ref[...] += jnp.dot(a_ref[...], b_ref[...],
                            preferred_element_type=jnp.float32)

    @pl.when(pl.program_id(2) == pl.num_programs(2) - 1)
    def _():
        y = acc_ref[...]
        if bias_ref is not None:
            y = y + bias_ref[...]
        if relu:
            y = jnp.maximum(y, 0.0)
        o_ref[...] = y.astype(o_ref.dtype)
        if st_ref is not None:
            tn = y.shape[1]
            st_ref[0:1, :] = jnp.sum(y, axis=0, keepdims=True)
            st_ref[1:2, :] = jnp.sum(y * y, axis=0, keepdims=True)
            st_ref[2:8, :] = jnp.zeros((6, tn), jnp.float32)


def pallas_matmul(a, b, bias=None, relu=False, compute_stats=False,
                  out_dtype=jnp.bfloat16):
    """(M,K)@(K,N). bf16 operands on the MXU, f32 accumulation.  Optional fused bias+ReLU
    epilogue; optional fused per-column sum / sum-of-squares (BatchNorm stats) outputs."""
    M, K = a.shape
    Kb, N = b.shape
    assert K == Kb
    a = a.astype(jnp.bfloat16)
    b = b.astype(jnp.bfloat16)

    tm = _pick_tm(M)
    Mp = _round_up(M, tm)

    Np = _round_up(N, 128)
    if Np != N:
        b = jnp.pad(b, ((0, 0), (0, Np - N)))
    if Np % 512 == 0:
        tn = 512
    elif Np % 256 == 0:
        tn = 256
    else:
        tn = 128

    if K % 128 != 0:                    # only the stem conv's tiny K=9 hits this
        Kp = _round_up(K, 128)
        tk = Kp
    elif K <= 2304:
        tk, Kp = K, K
    elif K % 2304 == 0:
        tk, Kp = 2304, K
    elif K % 1152 == 0:
        tk, Kp = 1152, K
    else:
        tk, Kp = 512, _round_up(K, 512)

    if (Mp, Kp) != (M, K):
        a = jnp.pad(a, ((0, Mp - M), (0, Kp - K)))
    if Kp != K:
        b = jnp.pad(b, ((0, Kp - K), (0, 0)))

    gi, gj, gk = Mp // tm, Np // tn, Kp // tk

    in_specs = [pl.BlockSpec((tm, tk), lambda i, j, k: (i, k)),
                pl.BlockSpec((tk, tn), lambda i, j, k: (k, j))]
    operands = [a, b]
    if bias is not None:
        bias_p = bias.astype(jnp.float32)
        if Np != N:
            bias_p = jnp.pad(bias_p, (0, Np - N))
        operands.append(bias_p.reshape(1, Np))
        in_specs.append(pl.BlockSpec((1, tn), lambda i, j, k: (0, j)))

    out_shape = [jax.ShapeDtypeStruct((Mp, Np), out_dtype)]
    out_specs = [pl.BlockSpec((tm, tn), lambda i, j, k: (i, j))]
    if compute_stats:
        out_shape.append(jax.ShapeDtypeStruct((8 * gi, Np), jnp.float32))
        out_specs.append(pl.BlockSpec((8, tn), lambda i, j, k: (i, j)))

    res = pl.pallas_call(
        functools.partial(_matmul_kernel, relu=relu, has_bias=bias is not None,
                          compute_stats=compute_stats),
        out_shape=tuple(out_shape),
        grid_spec=pltpu.PrefetchScalarGridSpec(
            num_scalar_prefetch=0,
            grid=(gi, gj, gk),
            in_specs=in_specs,
            out_specs=out_specs,
            scratch_shapes=[pltpu.VMEM((tm, tn), jnp.float32)]),
        compiler_params=pltpu.CompilerParams(
            dimension_semantics=("parallel", "parallel", "arbitrary"),
            vmem_limit_bytes=_VMEM_LIMIT),
    )(*operands)

    out = res[0]
    if Mp != M:
        out = out[:M]
    if Np != N:
        out = out[:, :N]
    if not compute_stats:
        return out
    st = res[1].reshape(gi, 8, Np)
    ssum = jnp.sum(st[:, 0, :], axis=0)
    ssq = jnp.sum(st[:, 1, :], axis=0)
    if Np != N:
        ssum, ssq = ssum[:N], ssq[:N]
    return out, ssum, ssq


# ---------- 3x3 stride-1 conv: shifted-row GEMM (no im2col), fused BN stats ----------

def _conv3x3_kernel(a_hbm, w_ref, o_ref, st_ref, abuf, acc_ref, sems,
                    *, tm, offs, img_w, img_h):
    hw = img_h * img_w
    i = pl.program_id(0)
    row0 = i * tm
    # Fire all 9 tap DMAs (contiguous row windows of the flat activation) up front so the
    # DMA engine overlaps with the MXU work below.
    for t in range(9):
        pltpu.make_async_copy(a_hbm.at[pl.ds(row0 + offs[t], tm)],
                              abuf.at[t], sems.at[t]).start()
    m = jax.lax.broadcasted_iota(jnp.int32, (tm, 1), 0) + row0
    col = m % img_w
    row = (m % hw) // img_w
    acc_ref[...] = jnp.zeros_like(acc_ref)
    for t in range(9):
        ti, tj = t // 3, t % 3
        pltpu.make_async_copy(a_hbm.at[pl.ds(row0 + offs[t], tm)],
                              abuf.at[t], sems.at[t]).wait()
        c = col + (tj - 1)
        r = row + (ti - 1)
        valid = (c >= 0) & (c < img_w) & (r >= 0) & (r < img_h)
        a = abuf[t] * valid.astype(jnp.bfloat16)      # zero-padding semantics via masking
        acc_ref[...] += jnp.dot(a, w_ref[t], preferred_element_type=jnp.float32)
    y = acc_ref[...]
    o_ref[...] = y.astype(o_ref.dtype)
    tn = y.shape[1]
    st_ref[0:1, :] = jnp.sum(y, axis=0, keepdims=True)
    st_ref[1:2, :] = jnp.sum(y * y, axis=0, keepdims=True)
    st_ref[2:8, :] = jnp.zeros((6, tn), jnp.float32)


def _conv3x3_stride1(x, w9):
    """x: (N,H,W,Cin) bf16, Cin a multiple of 128; w9: (9, Cin, Coutp) bf16."""
    n, h, w, cin = x.shape
    coutp = w9.shape[-1]
    m = n * h * w
    tm = min(256, _round_up(m, 8))
    mp = _round_up(m, tm)
    tn = min(coutp, 512)
    s_pad = w + 1
    a_ext = jnp.pad(x.reshape(m, cin).astype(jnp.bfloat16),
                    ((s_pad, mp - m + s_pad), (0, 0)))
    offs = tuple(s_pad + (ti - 1) * w + (tj - 1)
                 for ti in range(3) for tj in range(3))
    gi = mp // tm
    out, st = pl.pallas_call(
        functools.partial(_conv3x3_kernel, tm=tm, offs=offs, img_w=w, img_h=h),
        out_shape=(jax.ShapeDtypeStruct((mp, coutp), jnp.bfloat16),
                   jax.ShapeDtypeStruct((8 * gi, coutp), jnp.float32)),
        grid_spec=pltpu.PrefetchScalarGridSpec(
            num_scalar_prefetch=0,
            grid=(gi, coutp // tn),
            in_specs=[pl.BlockSpec(memory_space=pl.ANY),
                      pl.BlockSpec((9, cin, tn), lambda i, j: (0, 0, j))],
            out_specs=[pl.BlockSpec((tm, tn), lambda i, j: (i, j)),
                       pl.BlockSpec((8, tn), lambda i, j: (i, j))],
            scratch_shapes=[pltpu.VMEM((9, tm, cin), jnp.bfloat16),
                            pltpu.VMEM((tm, tn), jnp.float32),
                            pltpu.SemaphoreType.DMA((9,))]),
        compiler_params=pltpu.CompilerParams(
            dimension_semantics=("parallel", "parallel"),
            vmem_limit_bytes=_VMEM_LIMIT),
    )(a_ext, w9)
    st = st.reshape(gi, 8, coutp)
    return (out[:m].reshape(n, h, w, coutp),
            jnp.sum(st[:, 0, :], axis=0), jnp.sum(st[:, 1, :], axis=0))


# ------------------------------- conv dispatchers ------------------------------------------

def conv_1x1(x, wmat, stride=1):
    """x NHWC bf16; wmat (Cin_p, Coutp) bf16.  Returns (y, sum, sumsq)."""
    if stride > 1:
        # TODO(synk): fold the stride into the GEMM row index_map instead of this slice copy.
        x = x[:, ::stride, ::stride, :]
    n, h, w, c = x.shape
    out, ssum, ssq = pallas_matmul(x.reshape(n * h * w, c), wmat, compute_stats=True)
    return out.reshape(n, h, w, wmat.shape[1]), ssum, ssq


def conv_3x3(x, w9, stride=1):
    """x NHWC bf16; w9 (9, Cin_p, Coutp) bf16.  Returns (y, sum, sumsq)."""
    n, h, w, cin = x.shape
    coutp = w9.shape[-1]
    if stride == 1 and cin >= 64:
        return _conv3x3_stride1(x, w9)
    # Fallback (stem conv with cin=1 and the four stride-2 convs): im2col GEMM.
    # TODO(synk): fold the taps and stride into the GEMM index_map / manual DMA as well.
    xp = jnp.pad(x.astype(jnp.bfloat16), ((0, 0), (1, 1), (1, 1), (0, 0)))
    ho = (h + 2 - 3) // stride + 1
    wo = (w + 2 - 3) // stride + 1
    cols = [xp[:, i:i + stride * ho:stride, j:j + stride * wo:stride, :]
            for i in range(3) for j in range(3)]
    a = jnp.concatenate(cols, axis=-1).reshape(n * ho * wo, 9 * cin)
    out, ssum, ssq = pallas_matmul(a, w9.reshape(9 * cin, coutp), compute_stats=True)
    return out.reshape(n, ho, wo, coutp), ssum, ssq


# ------------- BatchNorm apply: fused scale/shift (+residual) (+ReLU), bf16 in/out ----------

def _bn_apply_kernel(*refs, relu, has_res):
    if has_res:
        x_ref, s_ref, b_ref, r_ref, o_ref = refs
    else:
        x_ref, s_ref, b_ref, o_ref = refs
        r_ref = None
    y = x_ref[...].astype(jnp.float32) * s_ref[...] + b_ref[...]
    if r_ref is not None:
        y = y + r_ref[...].astype(jnp.float32)
    if relu:
        y = jnp.maximum(y, 0.0)
    o_ref[...] = y.astype(o_ref.dtype)


def batchnorm_apply(x, gamma, beta, ssum, ssq, count, residual=None, relu=True):
    """Training-mode BatchNorm2d (batch stats, biased variance) applied to NHWC bf16 x, with
    the per-channel sums already produced by the conv GEMM epilogue.  Optional fused residual
    add and ReLU.  Emits bf16."""
    n, h, w, c = x.shape
    M = n * h * w
    mean = ssum / count
    # TODO(synk): E[x^2]-E[x]^2 in f32; switch to a shifted/two-pass form if BN inputs drift.
    var = jnp.maximum(ssq / count - mean * mean, 0.0)
    scale = gamma / jnp.sqrt(var + _BN_EPS)
    shift = beta - mean * scale

    xr = x.reshape(M, c)
    rr = residual.reshape(M, c) if residual is not None else None

    cap = max(8, min(4096, ((2 * 1024 * 1024) // (2 * c)) // 8 * 8))
    if M <= cap:
        tm, Mp = M, M
    else:
        tm = cap
        Mp = _round_up(M, tm)
        xr = jnp.pad(xr, ((0, Mp - M), (0, 0)))
        if rr is not None:
            rr = jnp.pad(rr, ((0, Mp - M), (0, 0)))

    operands = [xr, scale.reshape(1, c).astype(jnp.float32),
                shift.reshape(1, c).astype(jnp.float32)]
    in_specs = [pl.BlockSpec((tm, c), lambda i: (i, 0)),
                pl.BlockSpec((1, c), lambda i: (0, 0)),
                pl.BlockSpec((1, c), lambda i: (0, 0))]
    if rr is not None:
        operands.append(rr)
        in_specs.append(pl.BlockSpec((tm, c), lambda i: (i, 0)))

    y = pl.pallas_call(
        functools.partial(_bn_apply_kernel, relu=relu, has_res=rr is not None),
        out_shape=jax.ShapeDtypeStruct((Mp, c), jnp.bfloat16),
        grid_spec=pltpu.PrefetchScalarGridSpec(
            num_scalar_prefetch=0,
            grid=(Mp // tm,),
            in_specs=in_specs,
            out_specs=pl.BlockSpec((tm, c), lambda i: (i, 0))),
        compiler_params=pltpu.CompilerParams(
            dimension_semantics=("parallel",),
            vmem_limit_bytes=_VMEM_LIMIT),
    )(*operands)
    if Mp != M:
        y = y[:M]
    return y.reshape(n, h, w, c)


# ---------------- deterministic parameter init (synthetic, GEMM-ready layouts) -------------

def init_params(key, in_channel=1, feat_dim=128):
    keys = iter(jax.random.split(key, 256))

    def conv3x3_w(cin, cout, cin_p, cout_p):
        std = (2.0 / (cout * 9)) ** 0.5
        w = std * jax.random.normal(next(keys), (3, 3, cin, cout), jnp.float32)
        w = jnp.pad(w, ((0, 0), (0, 0), (0, cin_p - cin), (0, cout_p - cout)))
        return w.reshape(9, cin_p, cout_p).astype(jnp.bfloat16)

    def conv1x1_w(cin, cout, cin_p, cout_p):
        std = (2.0 / cout) ** 0.5
        w = std * jax.random.normal(next(keys), (cin, cout), jnp.float32)
        w = jnp.pad(w, ((0, cin_p - cin), (0, cout_p - cout)))
        return w.astype(jnp.bfloat16)

    def bn_p(cout, cout_p):
        gamma = jnp.pad(jnp.ones((cout,), jnp.float32), (0, cout_p - cout))
        beta = jnp.zeros((cout_p,), jnp.float32)
        return gamma, beta

    def linear_t(din, dout):
        k1, k2 = jax.random.split(next(keys))
        bound = 1.0 / (din ** 0.5)
        w_t = jax.random.uniform(k1, (din, dout), jnp.float32, -bound, bound)
        b = jax.random.uniform(k2, (dout,), jnp.float32, -bound, bound)
        return w_t.astype(jnp.bfloat16), b

    params = {}
    params['conv1'] = conv3x3_w(in_channel, 64, in_channel, 128)
    params['bn1'] = bn_p(64, 128)

    # resnet50 = Bottleneck blocks [3, 4, 6, 3]; channels padded to multiples of 128 so every
    # activation is lane-dense (padded channels stay exactly zero through conv/BN/ReLU).
    blocks_cfg = [(64, 3, 1), (128, 4, 2), (256, 6, 2), (512, 3, 2)]
    in_planes, in_p = 64, 128
    layers = []
    for planes, n_blocks, first_stride in blocks_cfg:
        pp = _round_up(planes, 128)
        op = 4 * planes
        layer = []
        for s in [first_stride] + [1] * (n_blocks - 1):
            blk = {'stride': s}
            blk['conv1'] = conv1x1_w(in_planes, planes, in_p, pp)
            blk['bn1'] = bn_p(planes, pp)
            blk['conv2'] = conv3x3_w(planes, planes, pp, pp)
            blk['bn2'] = bn_p(planes, pp)
            blk['conv3'] = conv1x1_w(planes, 4 * planes, pp, op)
            blk['bn3'] = bn_p(4 * planes, op)
            if s != 1 or in_planes != 4 * planes:
                blk['sc_conv'] = conv1x1_w(in_planes, 4 * planes, in_p, op)
                blk['sc_bn'] = bn_p(4 * planes, op)
            layer.append(blk)
            in_planes, in_p = 4 * planes, op
        layers.append(layer)
    params['layers'] = layers

    params['head1'] = linear_t(2048, 2048)       # Linear(2048, 2048)
    params['head2'] = linear_t(2048, feat_dim)   # Linear(2048, feat_dim)
    return params


# ---------------- model forward ----------------

def bottleneck_forward(blk, x):
    y, s, q = conv_1x1(x, blk['conv1'])
    cnt = y.shape[0] * y.shape[1] * y.shape[2]
    out = batchnorm_apply(y, *blk['bn1'], s, q, cnt, relu=True)
    # TODO(synk): fuse this BN apply as a per-K-channel prologue of the consuming GEMMs.
    y, s, q = conv_3x3(out, blk['conv2'], stride=blk['stride'])
    cnt = y.shape[0] * y.shape[1] * y.shape[2]
    out = batchnorm_apply(y, *blk['bn2'], s, q, cnt, relu=True)
    y, s, q = conv_1x1(out, blk['conv3'])
    cnt = y.shape[0] * y.shape[1] * y.shape[2]
    if 'sc_conv' in blk:
        ys, ss, qs = conv_1x1(x, blk['sc_conv'], stride=blk['stride'])
        scnt = ys.shape[0] * ys.shape[1] * ys.shape[2]
        sc = batchnorm_apply(ys, *blk['sc_bn'], ss, qs, scnt, relu=False)
    else:
        sc = x
    # relu(bn3(conv3(out)) + shortcut(x))   (is_last is always False in this model)
    return batchnorm_apply(y, *blk['bn3'], s, q, cnt, residual=sc, relu=True)


def resnet50_forward(params, x_nchw):
    x = jnp.transpose(x_nchw, (0, 2, 3, 1)).astype(jnp.bfloat16)   # NCHW -> NHWC
    y, s, q = conv_3x3(x, params['conv1'], stride=1)
    cnt = y.shape[0] * y.shape[1] * y.shape[2]
    out = batchnorm_apply(y, *params['bn1'], s, q, cnt, relu=True)
    for layer in params['layers']:
        for blk in layer:
            out = bottleneck_forward(blk, out)
    feat = jnp.mean(out.astype(jnp.float32), axis=(1, 2))   # AdaptiveAvgPool2d + flatten
    normed = feat / jnp.maximum(jnp.linalg.norm(feat, axis=1, keepdims=True), 1e-12)
    return feat, normed


def supcon_forward(params, x_nchw):
    feat, _ = resnet50_forward(params, x_nchw)
    w1, b1 = params['head1']
    h = pallas_matmul(feat, w1, bias=b1, relu=True, out_dtype=jnp.float32)   # Linear + ReLU
    w2, b2 = params['head2']
    h = pallas_matmul(h, w2, bias=b2, relu=False, out_dtype=jnp.float32)     # Linear
    # F.normalize(..., dim=1), eps = 1e-12
    return h / jnp.maximum(jnp.linalg.norm(h, axis=1, keepdims=True), 1e-12)


if __name__ == "__main__":
    key = jax.random.PRNGKey(0)
    pkey, xkey = jax.random.split(key)
    params = init_params(pkey, in_channel=1, feat_dim=128)
    # small input consistent with ResNet(in_channel=1): NCHW
    x = jax.random.normal(xkey, (2, 1, 8, 8), jnp.float32)
    out = supcon_forward(params, x)
    out = jax.block_until_ready(out)
    assert out.shape == (2, 128)
    print("KERNEL_OK")
</pallas_src>

<mosaic_0001>
module attributes {stable_mosaic.version = 11 : i64} {
  func.func @_matmul_kernel(%arg0: i32, %arg1: i32, %arg2: i32, %arg3: memref<128x128xbf16, #tpu.memory_space<vmem>>, %arg4: memref<128x128xbf16, #tpu.memory_space<vmem>>, %arg5: memref<128x128xbf16, #tpu.memory_space<vmem>>, %arg6: memref<8x128xf32, #tpu.memory_space<vmem>>, %arg7: memref<128x128xf32, #tpu.memory_space<vmem>>) attributes {dimension_semantics = [#tpu.dimension_semantics<parallel>, #tpu.dimension_semantics<parallel>, #tpu.dimension_semantics<arbitrary>], iteration_bounds = array<i64: 1, 1, 1>, scalar_prefetch = 0 : i64, scratch_operands = 1 : i64, tpu.core_type = #tpu.core_type<tc>, window_params = [{transform_indices = @transform_0, window_bounds = array<i64: 128, 128>}, {transform_indices = @transform_1, window_bounds = array<i64: 128, 128>}, {transform_indices = @transform_2, window_bounds = array<i64: 128, 128>}, {transform_indices = @transform_3, window_bounds = array<i64: 8, 128>}]} {
    %c0_i32 = arith.constant 0 : i32
    %0 = arith.cmpi eq, %arg2, %c0_i32 : i32
    %1 = arith.extui %0 : i1 to i32
    %c0_i32_0 = arith.constant 0 : i32
    %2 = arith.cmpi ne, %1, %c0_i32_0 : i32
    scf.if %2 {
      %cst_10 = arith.constant 0.000000e+00 : f32
      %12 = vector.broadcast %cst_10 : f32 to vector<128x128xf32>
      %c0_11 = arith.constant 0 : index
      %c0_12 = arith.constant 0 : index
      %13 = vector.load %arg7[%c0_11, %c0_12] : memref<128x128xf32, #tpu.memory_space<vmem>>, vector<128x128xf32>
      tpu.vector_store %arg7[%c0_11, %c0_12], %12 {strides = array<i32>} : memref<128x128xf32, #tpu.memory_space<vmem>>, vector<128x128xf32>,
    } else {
    }
    %c0 = arith.constant 0 : index
    %c0_1 = arith.constant 0 : index
    %3 = vector.load %arg7[%c0, %c0_1] : memref<128x128xf32, #tpu.memory_space<vmem>>, vector<128x128xf32>
    %c0_2 = arith.constant 0 : index
    %c0_3 = arith.constant 0 : index
    %4 = vector.load %arg3[%c0_2, %c0_3] : memref<128x128xbf16, #tpu.memory_space<vmem>>, vector<128x128xbf16>
    %c0_4 = arith.constant 0 : index
    %c0_5 = arith.constant 0 : index
    %5 = vector.load %arg4[%c0_4, %c0_5] : memref<128x128xbf16, #tpu.memory_space<vmem>>, vector<128x128xbf16>
    %cst = arith.constant dense<0.000000e+00> : vector<128x128xf32>
    %6 = tpu.matmul %4, %5, %cst {dimension_numbers = #tpu.dot_dimension_numbers<[1], [0], [0], [1], [0, 0, 1, 1], [], []>} : vector<128x128xbf16>, vector<128x128xbf16>, vector<128x128xf32> -> vector<128x128xf32>
    %7 = arith.addf %3, %6 : vector<128x128xf32>
    %c0_6 = arith.constant 0 : index
    %c0_7 = arith.constant 0 : index
    %8 = vector.load %arg7[%c0_6, %c0_7] : memref<128x128xf32, #tpu.memory_space<vmem>>, vector<128x128xf32>
    tpu.vector_store %arg7[%c0_6, %c0_7], %7 {strides = array<i32>} : memref<128x128xf32, #tpu.memory_space<vmem>>, vector<128x128xf32>,
    %c0_i32_8 = arith.constant 0 : i32
    %9 = arith.cmpi eq, %arg2, %c0_i32_8 : i32
    %10 = arith.extui %9 : i1 to i32
    %c0_i32_9 = arith.constant 0 : i32
    %11 = arith.cmpi ne, %10, %c0_i32_9 : i32
    scf.if %11 {
      %c0_10 = arith.constant 0 : index
      %c0_11 = arith.constant 0 : index
      %12 = vector.load %arg7[%c0_10, %c0_11] : memref<128x128xf32, #tpu.memory_space<vmem>>, vector<128x128xf32>
      %13 = arith.truncf %12 : vector<128x128xf32> to vector<128x128xbf16>
      %c0_12 = arith.constant 0 : index
      %c0_13 = arith.constant 0 : index
      %14 = vector.load %arg5[%c0_12, %c0_13] : memref<128x128xbf16, #tpu.memory_space<vmem>>, vector<128x128xbf16>
      tpu.vector_store %arg5[%c0_12, %c0_13], %13 {strides = array<i32>} : memref<128x128xbf16, #tpu.memory_space<vmem>>, vector<128x128xbf16>,
      %cst_14 = arith.constant dense<0.000000e+00> : vector<128xf32>
      %15 = vector.multi_reduction <add>, %12, %cst_14 [0] : vector<128x128xf32> to vector<128xf32>
      %16 = vector.shape_cast %15 : vector<128xf32> to vector<1x128xf32>
      %c0_15 = arith.constant 0 : index
      %c0_16 = arith.constant 0 : index
      %17 = vector.load %arg6[%c0_15, %c0_16] : memref<8x128xf32, #tpu.memory_space<vmem>>, vector<1x128xf32>
      tpu.vector_store %arg6[%c0_15, %c0_16], %16 {strides = array<i32>} : memref<8x128xf32, #tpu.memory_space<vmem>>, vector<1x128xf32>,
      %18 = arith.mulf %12, %12 : vector<128x128xf32>
      %cst_17 = arith.constant dense<0.000000e+00> : vector<128xf32>
      %19 = vector.multi_reduction <add>, %18, %cst_17 [0] : vector<128x128xf32> to vector<128xf32>
      %20 = vector.shape_cast %19 : vector<128xf32> to vector<1x128xf32>
      %c1 = arith.constant 1 : index
      %c0_18 = arith.constant 0 : index
      %21 = vector.load %arg6[%c1, %c0_18] : memref<8x128xf32, #tpu.memory_space<vmem>>, vector<1x128xf32>
      tpu.vector_store %arg6[%c1, %c0_18], %20 {strides = array<i32>} : memref<8x128xf32, #tpu.memory_space<vmem>>, vector<1x128xf32>,
      %cst_19 = arith.constant 0.000000e+00 : f32
      %22 = vector.broadcast %cst_19 : f32 to vector<6x128xf32>
      %c2 = arith.constant 2 : index
      %c0_20 = arith.constant 0 : index
      %23 = vector.load %arg6[%c2, %c0_20] : memref<8x128xf32, #tpu.memory_space<vmem>>, vector<6x128xf32>
      tpu.vector_store %arg6[%c2, %c0_20], %22 {strides = array<i32>} : memref<8x128xf32, #tpu.memory_space<vmem>>, vector<6x128xf32>,
    } else {
    }
    return
  }
  func.func @transform_0(%arg0: i32, %arg1: i32, %arg2: i32) -> (i32, i32) {
    %c0_i32 = arith.constant 0 : i32
    return %arg0, %arg2 : i32, i32
  }
  func.func @transform_1(%arg0: i32, %arg1: i32, %arg2: i32) -> (i32, i32) {
    %c0_i32 = arith.constant 0 : i32
    return %arg2, %arg1 : i32, i32
  }
  func.func @transform_2(%arg0: i32, %arg1: i32, %arg2: i32) -> (i32, i32) {
    %c0_i32 = arith.constant 0 : i32
    return %arg0, %arg1 : i32, i32
  }
  func.func @transform_3(%arg0: i32, %arg1: i32, %arg2: i32) -> (i32, i32) {
    %c0_i32 = arith.constant 0 : i32
    return %arg0, %arg1 : i32, i32
  }
}

</mosaic_0001>

<bundles_post_ra>
// kernel: tpu_custom_call.1
= control target key start
LH: loop header
LB: loop body
LE: loop exit
PB: predicated region body
PF: predicated region fallthrough
CT: control target
= control target key end

     0   :  { %9 = vsyncpa [#allocation4], 0  ;;  %s871_s0 = inlined_call_operand.hbm [shape: bf16[128,128], index: 0, kind: input, shape index: {}]   ;;  %s872_s1 = inlined_call_operand.hbm [shape: bf16[128,128], index: 1, kind: input, shape index: {}]   ;;  %s873_s2 = inlined_call_operand.hbm [shape: bf16[128,128], index: 2, kind: output, shape index: {0}]   ;;  %s874_s3 = inlined_call_operand.hbm [shape: f32[8,128], index: 3, kind: output, shape index: {1}]  }
   0x1   :  { %10 = vsyncpa [#allocation7], 0 }
   0x2   :  { %11 = vsyncpa [#allocation5], 0 }
   0x3   :  { %12 = vsyncpa [#allocation10], 0  ;;  %s799_s12 = smov [#allocation3]  }
   0x4   :  { %s18_s13 = sshll.u32 %s799_s12, 4  ;;  %s19_s13 = int_to_ptr.vmem [resolvable:$true] %s18_s13 }
   0x5   :  { %s719_s14 = scalar_lea.vmem %s19_s13, 1024  ;;  %p724_p1 = scmp.lt.s32.totalorder %s19_s13, %s19_s13 }
   0x6   :  { %p720_p0 = scmp.ne.s32.totalorder %s19_s13, %s719_s14  ;;  %p725_p2 = scmp.lt.s32.totalorder %s719_s14, %s719_s14 }
   0x8   :  { %p726_p3 = por %p725_p2, %p724_p1 }
   0xa   :  { %p727_p4 = pnand %p726_p3, %p720_p0 }
   0xc   :  { %730 = shalt.err (!%p727_p4)
}
   0xd   :  { %s800_s15 = smov 64   ;;  %s801_s16 = smov 4  }
   0xe   :  { %24 = dma.hbm_to_vmem [thread:$0]  %s871_s0, 1024, %s19_s13, [#allocation4], %s800_s15, %s800_s15, %s801_s16  }
   0xf   :  { %s802_s19 = smov [#allocation6]  }
  0x10   :  { %s30_s20 = sshll.u32 %s802_s19, 4  ;;  %s31_s20 = int_to_ptr.vmem [resolvable:$true] %s30_s20 }
  0x11   :  { %s739_s21 = scalar_lea.vmem %s31_s20, 1024  ;;  %p744_p6 = scmp.lt.s32.totalorder %s31_s20, %s31_s20 }
  0x12   :  { %p740_p5 = scmp.ne.s32.totalorder %s31_s20, %s739_s21  ;;  %p745_p7 = scmp.lt.s32.totalorder %s739_s21, %s739_s21 }
  0x14   :  { %p746_p8 = por %p745_p7, %p744_p6 }
  0x16   :  { %p747_p9 = pnand %p746_p8, %p740_p5 }
  0x18   :  { %750 = shalt.err (!%p747_p9)
}
  0x19   :  { %36 = dma.hbm_to_vmem [thread:$0]  %s872_s1, 1024, %s31_s20, [#allocation7], %s800_s15, %s800_s15, %s801_s16  }
  0x1a   :  { %791 = dma.done.wait [#allocation4], 1024  }
  0x1b   :  { %792 = vsyncadd [#allocation4], 4294966272 }
  0x1c   :  { %793 = dma.done.wait [#allocation7], 1024  }
  0x1d   :  { %794 = vsyncadd [#allocation7], 4294966272  ;;  %v695_v0 = vld [vmem:[#allocation6 + $0x38] sm:$0xff]   ;;  %v696_v1 = vld [vmem:[#allocation6 + $0x30] sm:$0xff]   ;;  %v803_v16 = vmov 0.0   ;;  %s804_s0 = smov [#allocation8]  }
  0x1e   :  { %640 = vmatprep.subr.bf16.mxu0 %v695_v0  ;;  %672 = vmatprep.subr.bf16.mxu1 %v695_v0  ;;  %v697_v2 = vld [vmem:[#allocation6 + $0x28] sm:$0xff]   ;;  %v698_v3 = vld [vmem:[#allocation6 + $0x20] sm:$0xff]   ;;  %v699_v5 = vld [vmem:[#allocation6 + $0x18] sm:$0xff]   ;;  %496 = vst [vmem:[#allocation9 + $0x2] sm:$0x3f] %v803_v16  ;;  %s502_s1 = sshll.u32 %s804_s0, 4  ;;  %s503_s1 = int_to_ptr.vmem [resolvable:$true] %s502_s1 }
  0x1f   :  { %641 = vmatpush3.bf16.msra.mxu0 %v695_v0  ;;  %680 = vmatpush3.bf16.msra.mxu1 %v695_v0  ;;  %v703_v4 = vld [vmem:[#allocation3] sm:$0xff]   ;;  %v700_v7 = vld [vmem:[#allocation6 + $0x10] sm:$0xff]   ;;  %v701_v8 = vld [vmem:[#allocation6 + $0x8] sm:$0xff]   ;;  %s751_s24 = scalar_lea.vmem %s503_s1, 1024  ;;  %p756_p11 = scmp.lt.s32.totalorder %s503_s1, %s503_s1 }
  0x20   :  { %642 = vmatprep.subr.bf16.mxu0 %v696_v1  ;;  %673 = vmatprep.subr.bf16.mxu1 %v696_v1  ;;  %v707_v6 = vld [vmem:[#allocation3 + $0x20] sm:$0xff]   ;;  %v704_v10 = vld [vmem:[#allocation3 + $0x8] sm:$0xff]   ;;  %v705_v12 = vld [vmem:[#allocation3 + $0x10] sm:$0xff]   ;;  %p752_p10 = scmp.ne.s32.totalorder %s503_s1, %s751_s24  ;;  %p757_p12 = scmp.lt.s32.totalorder %s751_s24, %s751_s24 }
  0x21   :  { %656 = vmatprep.mubr.bf16.mxu0 %v703_v4  ;;  %664 = vmatprep.mubr.bf16.mxu1 %v707_v6  ;;  %v702_v9 = vld [vmem:[#allocation6] sm:$0xff]   ;;  %v708_v11 = vld [vmem:[#allocation3 + $0x28] sm:$0xff]   ;;  %v709_v13 = vld [vmem:[#allocation3 + $0x30] sm:$0xff]  }
  0x22   :  { %v706_v14 = vld [vmem:[#allocation3 + $0x18] sm:$0xff]   ;;  %p758_p13 = por %p757_p12, %p756_p11 }
  0x23   :  { %643 = vmatpush3.bf16.msra.mxu0 %v696_v1  ;;  %681 = vmatpush3.bf16.msra.mxu1 %v696_v1  ;;  %v710_v15 = vld [vmem:[#allocation3 + $0x38] sm:$0xff]  }
  0x24   :  { %644 = vmatprep.subr.bf16.mxu0 %v697_v2  ;;  %674 = vmatprep.subr.bf16.mxu1 %v697_v2  ;;  %p759_p0 = pnand %p758_p13, %p752_p10 }
  0x27   :  { %645 = vmatpush3.bf16.msra.mxu0 %v697_v2  ;;  %682 = vmatpush3.bf16.msra.mxu1 %v697_v2 }
  0x28   :  { %646 = vmatprep.subr.bf16.mxu0 %v698_v3  ;;  %675 = vmatprep.subr.bf16.mxu1 %v698_v3 }
  0x2b   :  { %647 = vmatpush3.bf16.msra.mxu0 %v698_v3  ;;  %683 = vmatpush3.bf16.msra.mxu1 %v698_v3 }
  0x2c   :  { %648 = vmatprep.subr.bf16.mxu0 %v699_v5  ;;  %676 = vmatprep.subr.bf16.mxu1 %v699_v5 }
  0x2f   :  { %649 = vmatpush3.bf16.msra.mxu0 %v699_v5  ;;  %684 = vmatpush3.bf16.msra.mxu1 %v699_v5 }
  0x30   :  { %650 = vmatprep.subr.bf16.mxu0 %v700_v7  ;;  %677 = vmatprep.subr.bf16.mxu1 %v700_v7 }
  0x33   :  { %651 = vmatpush3.bf16.msra.mxu0 %v700_v7  ;;  %685 = vmatpush3.bf16.msra.mxu1 %v700_v7 }
  0x34   :  { %652 = vmatprep.subr.bf16.mxu0 %v701_v8  ;;  %678 = vmatprep.subr.bf16.mxu1 %v701_v8 }
  0x37   :  { %653 = vmatpush3.bf16.msra.mxu0 %v701_v8  ;;  %686 = vmatpush3.bf16.msra.mxu1 %v701_v8 }
  0x38   :  { %654 = vmatprep.subr.bf16.mxu0 %v702_v9  ;;  %679 = vmatprep.subr.bf16.mxu1 %v702_v9 }
  0x3b   :  { %655 = vmatpush3.bf16.msra.mxu0 %v702_v9  ;;  %687 = vmatpush3.bf16.msra.mxu1 %v702_v9 }
  0x3e   :  { %657 = vmatmul.mubr.bf16.vlgmr.msra.gmra.mxu0 %v704_v10  ;;  %665 = vmatmul.mubr.bf16.vlgmr.msra.gmra.mxu1 %v708_v11 }
  0x3f   :  { %660 = vmatprep.mubr.bf16.mxu0 %v705_v12  ;;  %668 = vmatprep.mubr.bf16.mxu1 %v709_v13 }
  0x46   :  { %661 = vmatmul.mubr.bf16.gmra.mxu0 %v706_v14  ;;  %669 = vmatmul.mubr.bf16.gmra.mxu1 %v710_v15 }
  0xfe   :  { %v658_v17 = vpop.f32.mrf.mxu0  ;;  %v838_v18 = vpop.f32.mrf.mxu1 }
  0xff   :  { %v460_v34 = vmul.f32 %v658_v17, %v658_v17 }
 0x100   :  { %v242_v19 = vpop.f32.mrf.mxu0  ;;  %v840_v20 = vpop.f32.mrf.mxu1 }
 0x101   :  { %v458_v25 = vmul.f32 %v242_v19, %v242_v19 }
 0x102   :  { %v659_v21 = vpop.f32.mrf.mxu0  ;;  %v842_v22 = vpop.f32.mrf.mxu1 }
 0x103   :  { %v585_v23 = vpack.c.bf16 %v659_v21, %v658_v17  ;;  %v605_v24 = vpack.c.bf16 %v842_v22, %v838_v18  ;;  %v461_v39 = vmul.f32 %v659_v21, %v659_v21 }
 0x104   :  { %v245_v26 = vpop.f32.mrf.mxu0  ;;  %v277_v27 = vpop.f32.mrf.mxu1 }
 0x105   :  { %617 = vst [vmem:[#allocation8 + $0x8] sm:$0xff] %v585_v23   ;;  %v580_v28 = vpack.c.bf16 %v245_v26, %v242_v19  ;;  %v436_v29 = vadd.f32 %v245_v26, %v242_v19  ;;  %v459_v30 = vmul.f32 %v245_v26, %v245_v26  ;;  %621 = vst [vmem:[#allocation8 + $0x28] sm:$0xff] %v605_v24  }
 0x106   :  { %v600_v31 = vpack.c.bf16 %v277_v27, %v840_v20  ;;  %v662_v32 = vpop.f32.mrf.mxu0  ;;  %v847_v33 = vpop.f32.mrf.mxu1 }
 0x107   :  { %581 = vst [vmem:[#allocation8] sm:$0xff] %v580_v28   ;;  %v437_v35 = vadd.f32 %v658_v17, %v436_v29  ;;  %v474_v36 = vadd.f32 %v459_v30, %v458_v25  ;;  %v464_v56 = vmul.f32 %v662_v32, %v662_v32 }
 0x108   :  { %620 = vst [vmem:[#allocation8 + $0x20] sm:$0xff] %v600_v31   ;;  %v258_v37 = vpop.f32.mrf.mxu0  ;;  %v290_v38 = vpop.f32.mrf.mxu1 }
 0x109   :  { %v475_v40 = vadd.f32 %v474_v36, %v460_v34  ;;  %v438_v41 = vadd.f32 %v659_v21, %v437_v35  ;;  %v462_v45 = vmul.f32 %v258_v37, %v258_v37 }
 0x10a   :  { %v663_v42 = vpop.f32.mrf.mxu0  ;;  %v671_v43 = vpop.f32.mrf.mxu1 }
 0x10b   :  { %v439_v44 = vadd.f32 %v438_v41, %v258_v37  ;;  %v476_v46 = vadd.f32 %v475_v40, %v461_v39  ;;  %v595_v47 = vpack.c.bf16 %v663_v42, %v662_v32  ;;  %v615_v49 = vpack.c.bf16 %v671_v43, %v847_v33 }
 0x10c   :  { %v261_v48 = vpop.f32.mrf.mxu0  ;;  %v293_v50 = vpop.f32.mrf.mxu1  ;;  %v465_v59 = vmul.f32 %v663_v42, %v663_v42 }
 0x10d   :  { %v477_v51 = vadd.f32 %v476_v46, %v462_v45  ;;  %619 = vst [vmem:[#allocation8 + $0x18] sm:$0xff] %v595_v47   ;;  %v590_v52 = vpack.c.bf16 %v261_v48, %v258_v37  ;;  %v440_v53 = vadd.f32 %v439_v44, %v261_v48  ;;  %v463_v54 = vmul.f32 %v261_v48, %v261_v48 }
 0x10e   :  { %623 = vst [vmem:[#allocation8 + $0x38] sm:$0xff] %v615_v49   ;;  %v610_v55 = vpack.c.bf16 %v293_v50, %v290_v38 }
 0x10f   :  { %618 = vst [vmem:[#allocation8 + $0x10] sm:$0xff] %v590_v52   ;;  %v441_v57 = vadd.f32 %v662_v32, %v440_v53  ;;  %v478_v58 = vadd.f32 %v477_v51, %v463_v54 }
 0x110   :  { %622 = vst [vmem:[#allocation8 + $0x30] sm:$0xff] %v610_v55  }
 0x111   :  { %v442_v60 = vadd.f32 %v663_v42, %v441_v57  ;;  %v479_v61 = vadd.f32 %v478_v58, %v464_v56 }
 0x112   :  { %762 = shalt.err (!%p759_p0)
}
 0x113   :  { %508 = dma.vmem_to_hbm [thread:$0]  %s503_s1, 1024, %s873_s2, [#allocation5], %s800_s15, %s800_s15, %s801_s16   ;;  %v466_v62 = vmul.f32 %v840_v20, %v840_v20  ;;  %v480_v63 = vadd.f32 %v479_v61, %v465_v59  ;;  %v443_v0 = vadd.f32 %v442_v60, %v840_v20  ;;  %v467_v2 = vmul.f32 %v277_v27, %v277_v27 }
 0x114   :  { %v468_v4 = vmul.f32 %v838_v18, %v838_v18  ;;  %v469_v7 = vmul.f32 %v842_v22, %v842_v22  ;;  %v470_v11 = vmul.f32 %v290_v38, %v290_v38  ;;  %v471_v15 = vmul.f32 %v293_v50, %v293_v50  ;;  %s805_s2 = smov [#allocation9]  }
 0x115   :  { %v444_v1 = vadd.f32 %v443_v0, %v277_v27  ;;  %v481_v3 = vadd.f32 %v480_v63, %v466_v62  ;;  %v472_v16 = vmul.f32 %v847_v33, %v847_v33  ;;  %s515_s27 = sshll.u32 %s805_s2, 4  ;;  %s516_s27 = int_to_ptr.vmem [resolvable:$true] %s515_s27 }
 0x116   :  { %s771_s28 = scalar_lea.vmem %s516_s27, 128  ;;  %p776_p2 = scmp.lt.s32.totalorder %s516_s27, %s516_s27 }
 0x117   :  { %v445_v5 = vadd.f32 %v838_v18, %v444_v1  ;;  %v482_v6 = vadd.f32 %v481_v3, %v467_v2  ;;  %v473_v18 = vmul.f32 %v671_v43, %v671_v43  ;;  %p772_p1 = scmp.ne.s32.totalorder %s516_s27, %s771_s28  ;;  %p777_p3 = scmp.lt.s32.totalorder %s771_s28, %s771_s28 }
 0x119   :  { %v483_v8 = vadd.f32 %v482_v6, %v468_v4  ;;  %v446_v9 = vadd.f32 %v842_v22, %v445_v5  ;;  %p778_p4 = por %p777_p3, %p776_p2 }
 0x11b   :  { %v447_v10 = vadd.f32 %v446_v9, %v290_v38  ;;  %v484_v12 = vadd.f32 %v483_v8, %v469_v7  ;;  %p779_p5 = pnand %p778_p4, %p772_p1 }
 0x11d   :  { %v485_v13 = vadd.f32 %v484_v12, %v470_v11  ;;  %v448_v14 = vadd.f32 %v447_v10, %v293_v50 }
 0x11f   :  { %v449_v17 = vadd.f32 %v847_v33, %v448_v14  ;;  %v486_v19 = vadd.f32 %v485_v13, %v471_v15 }
 0x121   :  { %v450_v20 = vadd.f32 %v671_v43, %v449_v17  ;;  %v487_v21 = vadd.f32 %v486_v19, %v472_v16 }
 0x123   :  { %v451_v23 = vrot.slane %v450_v20, 4  ;;  %v488_v24 = vadd.f32 %v487_v21, %v473_v18 }
 0x125   :  { %v452_v25 = vadd.f32 %v451_v23, %v450_v20  ;;  %v489_v26 = vrot.slane %v488_v24, 4 }
 0x127   :  { %v453_v22 = vrot.slane %v452_v25, 2  ;;  %v490_v27 = vadd.f32 %v489_v26, %v488_v24 }
 0x129   :  { %v454_v28 = vadd.f32 %v453_v22, %v452_v25  ;;  %v491_v29 = vrot.slane %v490_v27, 2 }
 0x12b   :  { %v455_v30 = vrot.slane %v454_v28, 1  ;;  %v492_v31 = vadd.f32 %v491_v29, %v490_v27 }
 0x12d   :  { %v456_v32 = vadd.f32 %v455_v30, %v454_v28  ;;  %v493_v34 = vrot.slane %v492_v31, 1 }
 0x12f   :  { %457 = vst [vmem:[#allocation9] sm:$0x1] %v456_v32  ;;  %v494_v33 = vadd.f32 %v493_v34, %v492_v31 }
 0x131   :  { %495 = vst [vmem:[#allocation9 + $0x1] sm:$0x1] %v494_v33 }
 0x132   :  { %782 = shalt.err (!%p779_p5)
}
 0x133   :  { %518 = dma.vmem_to_hbm [thread:$0]  %s516_s27, 128, %s874_s3, [#allocation10]  }
 0x134   :  { %795 = dma.done.wait [#allocation5], 1024  }
 0x135   :  { %796 = vsyncadd [#allocation5], 4294966272 }
 0x136   :  { %797 = dma.done.wait [#allocation10], 128  }
 0x137   :  { %798 = vsyncadd [#allocation10], 4294967168 }
 0x138   :  { %525 = vsyncpa [#allocation4], 1 }
 0x139   :  { %526 = vsyncpa [#allocation7], 1 }
 0x13a   :  { %527 = vsyncpa [#allocation5], 1 }
 0x13b   :  { %528 = vsyncpa [#allocation10], 1 }

</bundles_post_ra>
